<compile_context>
chip_gen: v7x
topology: tpu7x:2x2x1
jax: 0.10.0
libtpu: 0.0.40
codegen_flags: <defaults>
</compile_context>

<pallas_src>
import functools
import itertools
import math

import jax
import jax.numpy as jnp
from jax.experimental import pallas as pl
from jax.experimental.pallas import tpu as pltpu


def _bilinear_group_kernel(x_ref, w_ref, o_ref, *, num_fields, emb):
    # x_ref : (Bt, F*E)  field-flattened inputs for this batch tile
    # w_ref : (E, P*E)   concatenated per-pair weights, column block p = W_p^T
    # o_ref : (Bt, P*E)  lane-dense output slab (pairs contiguous along lanes)
    #
    # Static (trace-time) loop over the left field i; each iteration does one
    # fat matmul covering all pairs (i, j>i), then the elementwise product
    # with the contiguous v_j slab of the input.
    col = 0
    for i in range(num_fields - 1):
        width = (num_fields - 1 - i) * emb
        vi = x_ref[:, i * emb:(i + 1) * emb]                  # (Bt, E)
        wg = w_ref[:, col:col + width]                        # (E, width)
        y = jnp.dot(vi, wg, preferred_element_type=jnp.float32)
        vj = x_ref[:, (i + 1) * emb:num_fields * emb]         # (Bt, width)
        o_ref[:, col:col + width] = (y * vj).astype(o_ref.dtype)
        col += width


def bilinear_interaction(inputs, weights, *, block_b=256):
    """inputs: (B, F, E); weights: (P, E, E) with P = F*(F-1)//2.

    Returns (B, P, E), matching BilinearInteraction(bilinear_type='interaction').
    """
    B, F, E = inputs.shape
    P = F * (F - 1) // 2
    assert weights.shape == (P, E, E)

    # Pre-transpose + concatenate per-pair weights once in the wrapper:
    # w_cat[:, p*E:(p+1)*E] == weights[p].T  (nn.Linear: y = x @ W^T).
    # Pairs for left field i are contiguous in combinations order, so each
    # group's weight columns are a contiguous slice of w_cat.
    w_cat = jnp.transpose(weights, (2, 0, 1)).reshape(E, P * E)

    # Field-flattened, lane-dense input slab.
    x_flat = inputs.reshape(B, F * E)

    # Batch tiling: multiple of 8 sublanes; pad B up to a whole number of tiles.
    bt = min(block_b, B)
    bt = max(8, ((bt + 7) // 8) * 8)
    Bp = ((B + bt - 1) // bt) * bt
    if Bp != B:
        x_flat = jnp.pad(x_flat, ((0, Bp - B), (0, 0)))

    kernel = functools.partial(_bilinear_group_kernel, num_fields=F, emb=E)

    out_flat = pl.pallas_call(
        kernel,
        out_shape=jax.ShapeDtypeStruct((Bp, P * E), inputs.dtype),
        grid_spec=pltpu.PrefetchScalarGridSpec(
            num_scalar_prefetch=0,
            grid=(Bp // bt,),
            in_specs=[
                # batch-tiled field slab
                pl.BlockSpec((bt, F * E), lambda b: (b, 0)),
                # constant block index -> weights DMA'd once, stay VMEM-resident
                pl.BlockSpec((E, P * E), lambda b: (0, 0)),
            ],
            out_specs=pl.BlockSpec((bt, P * E), lambda b: (b, 0)),
        ),
        compiler_params=pltpu.CompilerParams(
            dimension_semantics=("parallel",)),
    )(x_flat, w_cat)

    if Bp != B:
        out_flat = out_flat[:B]
    # Row-major reshape: pair axis falls out of the lane-dense slab for free.
    return out_flat.reshape(B, P, E)


def bilinear_interaction_ref(inputs, weights):
    """Pure-JAX reference mirroring the PyTorch forward."""
    B, F, E = inputs.shape
    outs = []
    for p, (i, j) in enumerate(itertools.combinations(range(F), 2)):
        vi = inputs[:, i, :]
        vj = inputs[:, j, :]
        outs.append((vi @ weights[p].T) * vj)
    return jnp.stack(outs, axis=1)


if __name__ == "__main__":
    B, F, E = 8, 4, 32
    P = F * (F - 1) // 2

    key = jax.random.PRNGKey(0)
    k_in, k_w = jax.random.split(key)

    inputs = jax.random.normal(k_in, (B, F, E), dtype=jnp.float32)

    # Deterministic weight init mimicking nn.Linear default: U(-1/sqrt(E), 1/sqrt(E)).
    bound = 1.0 / math.sqrt(E)
    weights = jax.random.uniform(
        k_w, (P, E, E), minval=-bound, maxval=bound, dtype=jnp.float32)

    out = bilinear_interaction(inputs, weights)
    out = jax.block_until_ready(out)

    ref = bilinear_interaction_ref(inputs, weights)
    assert out.shape == (B, P, E)
    assert jnp.allclose(out, ref, atol=1e-5, rtol=1e-5)

    print("KERNEL_OK")
</pallas_src>

<mosaic_0001>
module attributes {stable_mosaic.version = 11 : i64} {
  func.func @_bilinear_group_kernel(%arg0: i32, %arg1: memref<8x128xf32, #tpu.memory_space<vmem>>, %arg2: memref<32x192xf32, #tpu.memory_space<vmem>>, %arg3: memref<8x192xf32, #tpu.memory_space<vmem>>) attributes {dimension_semantics = [#tpu.dimension_semantics<parallel>], iteration_bounds = array<i64: 1>, scalar_prefetch = 0 : i64, scratch_operands = 0 : i64, tpu.core_type = #tpu.core_type<tc>, window_params = [{transform_indices = @transform_0, window_bounds = array<i64: 8, 128>}, {pipeline_mode = #tpu.pipeline_mode<synchronous>, transform_indices = @transform_1, window_bounds = array<i64: 32, 192>}, {transform_indices = @transform_2, window_bounds = array<i64: 8, 192>}]} {
    %c0 = arith.constant 0 : index
    %c0_0 = arith.constant 0 : index
    %0 = vector.load %arg1[%c0, %c0_0] : memref<8x128xf32, #tpu.memory_space<vmem>>, vector<8x32xf32>
    %c0_1 = arith.constant 0 : index
    %c0_2 = arith.constant 0 : index
    %1 = vector.load %arg2[%c0_1, %c0_2] : memref<32x192xf32, #tpu.memory_space<vmem>>, vector<32x96xf32>
    %cst = arith.constant dense<0.000000e+00> : vector<8x96xf32>
    %2 = tpu.matmul %0, %1, %cst {dimension_numbers = #tpu.dot_dimension_numbers<[1], [0], [0], [1], [0, 0, 1, 1], [], []>} : vector<8x32xf32>, vector<32x96xf32>, vector<8x96xf32> -> vector<8x96xf32>
    %c0_3 = arith.constant 0 : index
    %c32 = arith.constant 32 : index
    %3 = vector.load %arg1[%c0_3, %c32] : memref<8x128xf32, #tpu.memory_space<vmem>>, vector<8x96xf32>
    %4 = arith.mulf %2, %3 : vector<8x96xf32>
    %c0_4 = arith.constant 0 : index
    %c0_5 = arith.constant 0 : index
    %5 = vector.load %arg3[%c0_4, %c0_5] : memref<8x192xf32, #tpu.memory_space<vmem>>, vector<8x96xf32>
    tpu.vector_store %arg3[%c0_4, %c0_5], %4 {strides = array<i32>} : memref<8x192xf32, #tpu.memory_space<vmem>>, vector<8x96xf32>,
    %c0_6 = arith.constant 0 : index
    %c32_7 = arith.constant 32 : index
    %6 = vector.load %arg1[%c0_6, %c32_7] : memref<8x128xf32, #tpu.memory_space<vmem>>, vector<8x32xf32>
    %c0_8 = arith.constant 0 : index
    %c96 = arith.constant 96 : index
    %7 = vector.load %arg2[%c0_8, %c96] : memref<32x192xf32, #tpu.memory_space<vmem>>, vector<32x64xf32>
    %cst_9 = arith.constant dense<0.000000e+00> : vector<8x64xf32>
    %8 = tpu.matmul %6, %7, %cst_9 {dimension_numbers = #tpu.dot_dimension_numbers<[1], [0], [0], [1], [0, 0, 1, 1], [], []>} : vector<8x32xf32>, vector<32x64xf32>, vector<8x64xf32> -> vector<8x64xf32>
    %c0_10 = arith.constant 0 : index
    %c64 = arith.constant 64 : index
    %9 = vector.load %arg1[%c0_10, %c64] : memref<8x128xf32, #tpu.memory_space<vmem>>, vector<8x64xf32>
    %10 = arith.mulf %8, %9 : vector<8x64xf32>
    %c0_11 = arith.constant 0 : index
    %c96_12 = arith.constant 96 : index
    %11 = vector.load %arg3[%c0_11, %c96_12] : memref<8x192xf32, #tpu.memory_space<vmem>>, vector<8x64xf32>
    tpu.vector_store %arg3[%c0_11, %c96_12], %10 {strides = array<i32>} : memref<8x192xf32, #tpu.memory_space<vmem>>, vector<8x64xf32>,
    %c0_13 = arith.constant 0 : index
    %c64_14 = arith.constant 64 : index
    %12 = vector.load %arg1[%c0_13, %c64_14] : memref<8x128xf32, #tpu.memory_space<vmem>>, vector<8x32xf32>
    %c0_15 = arith.constant 0 : index
    %c160 = arith.constant 160 : index
    %13 = vector.load %arg2[%c0_15, %c160] : memref<32x192xf32, #tpu.memory_space<vmem>>, vector<32x32xf32>
    %cst_16 = arith.constant dense<0.000000e+00> : vector<8x32xf32>
    %14 = tpu.matmul %12, %13, %cst_16 {dimension_numbers = #tpu.dot_dimension_numbers<[1], [0], [0], [1], [0, 0, 1, 1], [], []>} : vector<8x32xf32>, vector<32x32xf32>, vector<8x32xf32> -> vector<8x32xf32>
    %c0_17 = arith.constant 0 : index
    %c96_18 = arith.constant 96 : index
    %15 = vector.load %arg1[%c0_17, %c96_18] : memref<8x128xf32, #tpu.memory_space<vmem>>, vector<8x32xf32>
    %16 = arith.mulf %14, %15 : vector<8x32xf32>
    %c0_19 = arith.constant 0 : index
    %c160_20 = arith.constant 160 : index
    %17 = vector.load %arg3[%c0_19, %c160_20] : memref<8x192xf32, #tpu.memory_space<vmem>>, vector<8x32xf32>
    tpu.vector_store %arg3[%c0_19, %c160_20], %16 {strides = array<i32>} : memref<8x192xf32, #tpu.memory_space<vmem>>, vector<8x32xf32>,
    return
  }
  func.func @transform_0(%arg0: i32) -> (i32, i32) {
    %c0_i32 = arith.constant 0 : i32
    %c0_i32_0 = arith.constant 0 : i32
    return %arg0, %c0_i32 : i32, i32
  }
  func.func @transform_1(%arg0: i32) -> (i32, i32) {
    %c0_i32 = arith.constant 0 : i32
    %c0_i32_0 = arith.constant 0 : i32
    %c0_i32_1 = arith.constant 0 : i32
    return %c0_i32, %c0_i32_0 : i32, i32
  }
  func.func @transform_2(%arg0: i32) -> (i32, i32) {
    %c0_i32 = arith.constant 0 : i32
    %c0_i32_0 = arith.constant 0 : i32
    return %arg0, %c0_i32 : i32, i32
  }
}

</mosaic_0001>

<bundles_post_ra>
// kernel: tpu_custom_call.1
= control target key start
LH: loop header
LB: loop body
LE: loop exit
PB: predicated region body
PF: predicated region fallthrough
CT: control target
= control target key end

     0   :  { %7 = vsyncpa [#allocation3], 0  ;;  %s651_s0 = inlined_call_operand.hbm [shape: f32[8,128], index: 0, kind: input, shape index: {}]   ;;  %s652_s1 = inlined_call_operand.hbm [shape: f32[32,192], index: 1, kind: input, shape index: {}]   ;;  %s653_s2 = inlined_call_operand.hbm [shape: f32[8,192], index: 2, kind: output, shape index: {}]  }
   0x1   :  { %8 = vsyncpa [#allocation6], 0 }
   0x2   :  { %9 = vsyncpa [#allocation4], 0  ;;  %s554_s9 = smov [#allocation2]   ;;  %s555_s11 = smov [#allocation5]  }
   0x3   :  { %s16_s10 = sshll.u32 %s554_s9, 4  ;;  %s25_s12 = sshll.u32 %s555_s11, 4  ;;  %s17_s10 = int_to_ptr.vmem [resolvable:$true] %s16_s10  ;;  %s580_s12 = int_to_ptr.vmem [resolvable:$true] %s25_s12 }
   0x4   :  { %s482_s15 = scalar_lea.hbm %s651_s0, 128 }
   0x5   :  { %p483_p0 = scmp.ne.s32.totalorder %s651_s0, %s482_s15  ;;  %p486_p1 = scmp.lt.u32.totalorder %s482_s15, %s651_s0 }
   0x7   :  { %p488_p2 = pnand %p486_p1, %p483_p0 }
   0x9   :  { %491 = shalt.err (!%p488_p2)
}
   0xa   :  { %s492_s20 = scalar_lea.vmem %s17_s10, 128  ;;  %p497_p4 = scmp.lt.s32.totalorder %s17_s10, %s17_s10 }
   0xb   :  { %p493_p3 = scmp.ne.s32.totalorder %s17_s10, %s492_s20  ;;  %p498_p5 = scmp.lt.s32.totalorder %s492_s20, %s492_s20 }
   0xd   :  { %p499_p6 = por %p498_p5, %p497_p4 }
   0xf   :  { %p500_p7 = pnand %p499_p6, %p493_p3 }
  0x11   :  { %503 = shalt.err (!%p500_p7)
}
  0x12   :  { %19 = dma.hbm_to_vmem [thread:$0]  %s651_s0, 128, %s17_s10, [#allocation3]  }
  0x13   :  { %s504_s25 = scalar_lea.hbm %s652_s1, 1024 }
  0x14   :  { %p505_p8 = scmp.ne.s32.totalorder %s652_s1, %s504_s25  ;;  %p508_p9 = scmp.lt.u32.totalorder %s504_s25, %s652_s1 }
  0x16   :  { %p510_p10 = pnand %p508_p9, %p505_p8 }
  0x18   :  { %513 = shalt.err (!%p510_p10)
}
  0x19   :  { %s514_s30 = scalar_lea.vmem %s580_s12, 1024  ;;  %p519_p12 = scmp.lt.s32.totalorder %s580_s12, %s580_s12 }
  0x1a   :  { %p515_p11 = scmp.ne.s32.totalorder %s580_s12, %s514_s30  ;;  %p520_p13 = scmp.lt.s32.totalorder %s514_s30, %s514_s30 }
  0x1c   :  { %p521_p0 = por %p520_p13, %p519_p12 }
  0x1e   :  { %p522_p1 = pnand %p521_p0, %p515_p11 }
  0x20   :  { %525 = shalt.err (!%p522_p1)
}
  0x21   :  { %s556_s0 = smov 256   ;;  %s557_s3 = smov 16  }
  0x22   :  { %31 = dma.hbm_to_vmem [thread:$0]  %s652_s1, 1024, %s580_s12, [#allocation6], %s556_s0, %s556_s0, %s557_s3  }
  0x23   :  { %548 = dma.done.wait [#allocation3], 128  }
  0x24   :  { %549 = vsyncadd [#allocation3], 4294967168 }
  0x25   :  { %550 = dma.done.wait [#allocation6], 1024  }
  0x26   :  { %551 = vsyncadd [#allocation6], 4294966272  ;;  %v558_v0 = vmov 0.0|0.0   ;;  %vm559_vm0 = vmmov 0   ;;  %v560_v1 = vmov 0.0   ;;  %v124_v2 = vld [vmem:[#allocation5] sm:$0xff] }
  0x27   :  { %423 = vmatprep.subr.bf16.mxu0 %v558_v0  ;;  %429 = vmatprep.subr.bf16.mxu1 %v558_v0  ;;  %v125_v3 = vld [vmem:[#allocation5 + $0x8] sm:$0xff]  ;;  %v252_v4 = vld [vmem:[#allocation5 + $0x18] sm:$0xff]  ;;  %v126_v7 = vld [vmem:[#allocation5 + $0x10] sm:$0xff]  ;;  %s561_s1 = smov 32   ;;  %s562_s6 = smov 96   ;;  %vm43_vm1 = vcmask 261120  }
  0x28   :  { %398 = vmatprep.mubr.msk.f32.mxu0 %vm559_vm0, %v560_v1  ;;  %409 = vmatprep.mubr.msk.f32.mxu1 %vm559_vm0, %v560_v1  ;;  %v452_v5 = vpack.i.bf16 %v125_v3, %v124_v2  ;;  %v462_v6 = vpack.i.bf16 %v252_v4, %v125_v3  ;;  %v128_v8 = vld [vmem:[#allocation5 + $0x20] sm:$0xff]  ;;  %v129_v9 = vld [vmem:[#allocation5 + $0x28] sm:$0xff]  ;;  %v424_v10 = vpack.c.bf16 %v126_v7, %v124_v2  ;;  %v130_v13 = vld [vmem:[#allocation5 + $0x30] sm:$0xff]  ;;  %s563_s7 = smov 64   ;;  %vm121_vm2 = vcmask 785408   ;;  %s564_s8 = smov [#allocation7]  }
  0x29   :  { %v457_v11 = vpack.i.bf16 %v252_v4, %v126_v7  ;;  %v467_v12 = vpack.i.bf16 %v129_v9, %v128_v8  ;;  %v131_v14 = vld [vmem:[#allocation5 + $0x38] sm:$0xff]  ;;  %v427_v15 = vpack.c.bf16 %v130_v13, %v128_v8  ;;  %s362_s9 = sshll.u32 %s564_s8, 4  ;;  %vm247_vm3 = vcmask 1048320   ;;  %s363_s9 = int_to_ptr.vmem [resolvable:$true] %s362_s9 }
  0x2a   :  { %453 = vrot.lane.b32.xlu0 %v452_v5, %s561_s1  ;;  %463 = vrot.lane.b32.xlu1 %v462_v6, %s562_s6  ;;  %v472_v16 = vpack.i.bf16 %v131_v14, %v130_v13  ;;  %v477_v17 = vpack.i.bf16 %v131_v14, %v129_v9  ;;  %v250_v18 = vld [vmem:[#allocation2] sm:$0xff]  ;;  %vm354_vm4 = vcmask 523520   ;;  %s526_s10 = scalar_lea.vmem %s363_s9, 256  ;;  %p531_p3 = scmp.lt.s32.totalorder %s363_s9, %s363_s9 }
  0x2b   :  { %425 = vmatpush3.bf16.msra.mxu0 %v424_v10  ;;  %p527_p2 = scmp.ne.s32.totalorder %s363_s9, %s526_s10  ;;  %p532_p4 = scmp.lt.s32.totalorder %s526_s10, %s526_s10 }
  0x2c   :  { %426 = vmatprep.subr.bf16.mxu0 %v558_v0 }
  0x2d   :  { %p533_p5 = por %p532_p4, %p531_p3 }
  0x2e   :  { %458 = vrot.lane.b32.xlu0 %v457_v11, %s561_s1  ;;  %468 = vrot.lane.b32.xlu1 %v467_v12, %s561_s1 }
  0x2f   :  { %428 = vmatpush3.bf16.msra.mxu0 %v427_v15  ;;  %p534_p6 = pnand %p533_p5, %p527_p2 }
  0x30   :  { %435 = vmatprep.subr.bf16.mxu0 %v558_v0 }
  0x32   :  { %473 = vrot.lane.b32.xlu0 %v472_v16, %s561_s1  ;;  %478 = vrot.lane.b32.xlu1 %v477_v17, %s562_s6 }
  0x33   :  { %399 = vmatmul.mubr.msk.f32.vlgmr.msra.gmra.mrb[0].mxu0 %vm43_vm1, %v250_v18 }
  0x34   :  { %420 = vmatprep.mubr.msk.f32.mxu0 %vm559_vm0, %v560_v1 }
  0x36   :  { %256 = vrot.lane.b32.xlu1 %v250_v18, %s563_s7  ;;  %133 = vrot.lane.b32.xlu0 %v250_v18, %s562_s6 }
  0x3a   :  { %239 = vrot.lane.b32.xlu0 %v250_v18, %s563_s7  ;;  %346 = vrot.lane.b32.xlu1 %v250_v18, %s561_s1 }
  0x3e   :  { %117 = vrot.lane.b32.xlu0 %v250_v18, %s562_s6 }
  0x9c   :  { %v454_v19 = vpop.permute.xlu0 %453  ;;  %v464_v20 = vpop.permute.xlu1 %463 }
  0x9d   :  { %v466_v21 = vunpack.i.h.bf16 %v464_v20  ;;  %v465_v22 = vunpack.i.l.bf16 %v464_v20  ;;  %v456_v23 = vunpack.i.h.bf16 %v454_v19  ;;  %v455_v24 = vunpack.i.l.bf16 %v454_v19 }
  0x9f   :  { %v436_v25 = vpack.c.bf16 %v466_v21, %v465_v22  ;;  %v159_v32 = vsel %vm43_vm1, %v455_v24, %v456_v23 }
  0xa0   :  { %v459_v26 = vpop.permute.xlu0 %458  ;;  %v469_v27 = vpop.permute.xlu1 %468 }
  0xa1   :  { %v461_v28 = vunpack.i.h.bf16 %v459_v26  ;;  %v460_v29 = vunpack.i.l.bf16 %v459_v26  ;;  %437 = vmatpush3.bf16.msra.mxu0 %v436_v25  ;;  %v471_v30 = vunpack.i.h.bf16 %v469_v27  ;;  %v470_v31 = vunpack.i.l.bf16 %v469_v27 }
  0xa2   :  { %438 = vmatprep.subr.bf16.mxu0 %v558_v0 }
  0xa3   :  { %v160_v33 = vsel %vm43_vm1, %v460_v29, %v461_v28  ;;  %v161_v42 = vsel %vm43_vm1, %v470_v31, %v471_v30 }
  0xa4   :  { %v474_v34 = vpop.permute.xlu0 %473  ;;  %v479_v35 = vpop.permute.xlu1 %478  ;;  %v430_v36 = vpack.c.bf16 %v160_v33, %v159_v32 }
  0xa5   :  { %v476_v37 = vunpack.i.h.bf16 %v474_v34  ;;  %v475_v38 = vunpack.i.l.bf16 %v474_v34  ;;  %v481_v39 = vunpack.i.h.bf16 %v479_v35  ;;  %v480_v40 = vunpack.i.l.bf16 %v479_v35 }
  0xa6   :  { %431 = vmatpush3.bf16.msra.mxu1 %v430_v36 }
  0xa7   :  { %v439_v41 = vpack.c.bf16 %v481_v39, %v480_v40  ;;  %432 = vmatprep.subr.bf16.mxu1 %v558_v0  ;;  %v162_v43 = vsel %vm43_vm1, %v475_v38, %v476_v37 }
  0xa8   :  { %v433_v44 = vpack.c.bf16 %v162_v43, %v161_v42  ;;  %v257_v45 = vpop.permute.xlu1 %256  ;;  %v134_v46 = vpop.permute.xlu0 %133 }
  0xa9   :  { %440 = vmatpush3.bf16.msra.mxu0 %v439_v41 }
  0xaa   :  { %434 = vmatpush3.bf16.msra.mxu1 %v433_v44 }
  0xac   :  { %421 = vmatmul.mubr.msk.f32.vlgmr.msra.gmra.mrb[2].mxu0 %vm43_vm1, %v257_v45  ;;  %v240_v47 = vpop.permute.xlu0 %239  ;;  %v347_v52 = vpop.permute.xlu1 %346 }
  0xad   :  { %410 = vmatmul.mubr.msk.f32.vlgmr.msra.gmra.mrb[0].mxu1 %vm43_vm1, %v134_v46 }
  0xb0   :  { %v118_v48 = vpop.permute.xlu0 %117 }
 0x106   :  { %v113_v49 = vpop.f32.mrb[0].mxu0 }
 0x107   :  { %v120_v50 = vmul.f32 %v118_v48, %v113_v49  ;;  %v400_v51 = vpop.f32.mrb[1].mxu0 }
 0x109   :  { %122 = vst.msk [vmem:[#allocation7] sm:$0xff] %vm121_vm2, %v120_v50 }
 0x17f   :  { %v342_v53 = vpop.f32.mrb[2].mxu0 }
 0x180   :  { %v235_v54 = vpop.f32.mrb[0].mxu1  ;;  %v349_v55 = vmul.f32 %v347_v52, %v342_v53  ;;  %v422_v56 = vpop.f32.mrb[3].mxu0 }
 0x181   :  { %v242_v57 = vmul.f32 %v240_v47, %v235_v54  ;;  %v411_v58 = vpop.f32.mrb[1].mxu1 }
 0x182   :  { %351 = vrot.lane.b32.xlu0 %v349_v55, %s561_s1 }
 0x183   :  { %244 = vrot.lane.b32.xlu1 %v242_v57, %s562_s6 }
 0x1f4   :  { %v352_v59 = vpop.permute.xlu0 %351 }
 0x1f5   :  { %v245_v60 = vpop.permute.xlu1 %244 }
 0x1f6   :  { %249 = vst.msk [vmem:[#allocation7 + $0x8] sm:$0xff] %vm43_vm1, %v245_v60 }
 0x1f7   :  { %248 = vst.msk [vmem:[#allocation7] sm:$0xff] %vm247_vm3, %v245_v60 }
 0x1f8   :  { %355 = vst.msk [vmem:[#allocation7 + $0x8] sm:$0xff] %vm354_vm4, %v352_v59 }
 0x1f9   :  { %537 = shalt.err (!%p534_p6)
}
 0x1fa   :  { %s538_s13 = scalar_lea.hbm %s653_s2, 256 }
 0x1fb   :  { %p539_p7 = scmp.ne.s32.totalorder %s653_s2, %s538_s13  ;;  %p542_p8 = scmp.lt.u32.totalorder %s538_s13, %s653_s2 }
 0x1fd   :  { %p544_p9 = pnand %p542_p8, %p539_p7 }
 0x1ff   :  { %547 = shalt.err (!%p544_p9)
}
 0x200   :  { %365 = dma.vmem_to_hbm [thread:$0]  %s363_s9, 256, %s653_s2, [#allocation4]  }
 0x201   :  { %552 = dma.done.wait [#allocation4], 256  }
 0x202   :  { %553 = vsyncadd [#allocation4], 4294967040 }
 0x203   :  { %369 = vsyncpa [#allocation3], 1 }
 0x204   :  { %370 = vsyncpa [#allocation6], 1 }
 0x205   :  { %371 = vsyncpa [#allocation4], 1 }

</bundles_post_ra>
